<compile_context>
chip_gen: v7x
topology: tpu7x:2x2x1
jax: 0.10.0
libtpu: 0.0.40
codegen_flags: <defaults>
</compile_context>

<pallas_src>
import functools

import jax
import jax.numpy as jnp
from jax.experimental import pallas as pl
from jax.experimental.pallas import tpu as pltpu

LANE = 128
SUBLANE = 8


def _round_up(n, m):
    return ((n + m - 1) // m) * m


def _pad2d(a, rows, cols):
    return jnp.pad(a, ((0, rows - a.shape[0]), (0, cols - a.shape[1])))


# --------------------------------------------------------------------------
# Kernel
# --------------------------------------------------------------------------
def _abs_max_gate(y, d, num_segments, hidden):
    """y * sigmoid(dendrite activation with max |value| over segments).

    `d` is the (B, num_segments*hidden) slab ctx @ wseg_flat; segment s lives
    in columns [s*hidden, (s+1)*hidden) (static, lane-aligned slices).
    Strict '>' keeps the first occurrence on ties (== argmax semantics).
    """
    sel = d[:, 0:hidden]
    best = jnp.abs(sel)
    for s in range(1, num_segments):  # unrolled: num_segments is small & static
        a = d[:, s * hidden:(s + 1) * hidden]
        aa = jnp.abs(a)  # single abs, reused for compare + update
        take = aa > best
        sel = jnp.where(take, a, sel)
        best = jnp.where(take, aa, best)
    return y * jax.nn.sigmoid(sel)


def dendritic_mlp_kernel(
    x_ref, ctx_ref,
    w1_ref, b1_ref, ws1_ref,
    w2_ref, b2_ref, ws2_ref,
    wc_ref, bc_ref,
    out_ref,
    *, num_segments,
):
    hidden = w1_ref.shape[1]          # padded hidden size
    x = x_ref[...]                    # (TB, Dp)   bf16
    ctx = ctx_ref[...]                # (TB, Cp)   bf16

    # ---- dendritic layer 1 (one fused (B,C)x(C,S*H) segment matmul) ----
    y1 = jnp.dot(x, w1_ref[...], preferred_element_type=jnp.float32) + b1_ref[...]
    d1 = jnp.dot(ctx, ws1_ref[...], preferred_element_type=jnp.float32)
    h1 = _abs_max_gate(y1, d1, num_segments, hidden).astype(x.dtype)

    # ---- dendritic layer 2 ----
    y2 = jnp.dot(h1, w2_ref[...], preferred_element_type=jnp.float32) + b2_ref[...]
    d2 = jnp.dot(ctx, ws2_ref[...], preferred_element_type=jnp.float32)
    h2 = _abs_max_gate(y2, d2, num_segments, hidden).astype(x.dtype)

    # ---- classifier (no dendrites) ----
    out = jnp.dot(h2, wc_ref[...], preferred_element_type=jnp.float32) + bc_ref[...]
    out_ref[...] = out.astype(out_ref.dtype)


# --------------------------------------------------------------------------
# pallas_call wrapper
# --------------------------------------------------------------------------
@jax.jit
def _forward_padded(x_p, ctx_p, w1, b1, ws1, w2, b2, ws2, wc, bc):
    bp, dp = x_p.shape
    cp = ctx_p.shape[1]
    hp = w1.shape[1]
    op = wc.shape[1]
    num_segments = ws1.shape[1] // hp
    tb = min(128, bp)                         # batch tile (bp is a multiple of tb)
    grid = (bp // tb,)

    def act_spec(feat):
        return pl.BlockSpec((tb, feat), lambda i: (i, 0))

    def const_spec(shape):                    # weights stay VMEM-resident
        return pl.BlockSpec(shape, lambda i: (0, 0))

    flops = 2 * bp * (dp * hp + hp * hp + hp * op + 2 * num_segments * cp * hp)
    weight_bytes = sum(int(a.size) * a.dtype.itemsize
                       for a in (w1, b1, ws1, w2, b2, ws2, wc, bc))
    io_bytes = (int(x_p.size) * x_p.dtype.itemsize
                + int(ctx_p.size) * ctx_p.dtype.itemsize
                + weight_bytes + bp * op * 4)
    # double-buffered activation tiles + resident weights, with 2x margin
    act_tile_bytes = 2 * (x_p.dtype.itemsize * tb * (dp + cp) + 4 * tb * op)
    vmem_limit = int(min(max(2 * (weight_bytes + act_tile_bytes), 16 << 20), 64 << 20))

    return pl.pallas_call(
        functools.partial(dendritic_mlp_kernel, num_segments=num_segments),
        out_shape=jax.ShapeDtypeStruct((bp, op), jnp.float32),
        grid=grid,
        in_specs=[
            act_spec(dp), act_spec(cp),
            const_spec((dp, hp)), const_spec((1, hp)),
            const_spec((cp, num_segments * hp)),
            const_spec((hp, hp)), const_spec((1, hp)),
            const_spec((cp, num_segments * hp)),
            const_spec((hp, op)), const_spec((1, op)),
        ],
        out_specs=act_spec(op),
        compiler_params=pltpu.CompilerParams(
            dimension_semantics=("parallel",),
            vmem_limit_bytes=vmem_limit),
        cost_estimate=pl.CostEstimate(
            flops=int(flops),
            transcendentals=int(2 * bp * hp),
            bytes_accessed=int(io_bytes)),
    )(x_p, ctx_p, w1, b1, ws1, w2, b2, ws2, wc, bc)


def dendritic_mlp_forward(x, context, params):
    """Public entry: pads batch/features, runs the kernel, strips padding."""
    B = x.shape[0]
    kp = params["kernel"]
    dp = kp["w1"].shape[0]
    cp = kp["ws1"].shape[0]
    tb = 128 if B >= 128 else _round_up(max(B, 1), SUBLANE)
    bp = _round_up(B, tb)
    x_p = _pad2d(x.astype(jnp.bfloat16), bp, dp)
    ctx_p = _pad2d(context.astype(jnp.bfloat16), bp, cp)
    out_p = _forward_padded(
        x_p, ctx_p,
        kp["w1"], kp["b1"], kp["ws1"],
        kp["w2"], kp["b2"], kp["ws2"],
        kp["wc"], kp["bc"])
    return out_p[:B, :params["output_size"]]


# --------------------------------------------------------------------------
# Parameters (synthetic, deterministic) + pure-JAX reference
# --------------------------------------------------------------------------
def init_params(key, input_size, output_size, hidden_size, num_segments,
                dim_context, sparsity):
    """Synthetic parameters mimicking the module's shapes.

    SparseWeights / dendrite sparsity are fixed Bernoulli zero-masks applied at
    init; the forward pass is a dense computation on the sparsified weights,
    exactly as in SparseWeights.forward. Weights are bf16-quantized once and
    the SAME values feed both the kernel and the reference.
    """
    keys = jax.random.split(key, 12)
    keep = 1.0 - sparsity

    def sparse(k_w, k_m, shape, fan_in):
        bound = 1.0 / jnp.sqrt(fan_in)
        w = jax.random.uniform(k_w, shape, jnp.float32, -bound, bound)
        mask = jax.random.bernoulli(k_m, keep, shape).astype(jnp.float32)
        return w * mask

    w1 = sparse(keys[0], keys[1], (hidden_size, input_size), input_size)
    b1 = jax.random.uniform(keys[2], (hidden_size,), jnp.float32,
                            -1.0 / jnp.sqrt(input_size), 1.0 / jnp.sqrt(input_size))
    wseg1 = sparse(keys[3], keys[4], (hidden_size, num_segments, dim_context),
                   dim_context)
    w2 = sparse(keys[5], keys[6], (hidden_size, hidden_size), hidden_size)
    b2 = jax.random.uniform(keys[7], (hidden_size,), jnp.float32,
                            -1.0 / jnp.sqrt(hidden_size), 1.0 / jnp.sqrt(hidden_size))
    wseg2 = sparse(keys[8], keys[9], (hidden_size, num_segments, dim_context),
                   dim_context)
    wc = sparse(keys[10], keys[11], (output_size, hidden_size), hidden_size)
    bc = jnp.zeros((output_size,), jnp.float32)

    # bf16-quantize once so kernel and reference see identical weight values.
    q = lambda a: a.astype(jnp.bfloat16)
    w1_q, w2_q, wc_q = q(w1), q(w2), q(wc)
    ws1_q, ws2_q = q(wseg1), q(wseg2)

    dp = _round_up(input_size, LANE)
    cp = _round_up(dim_context, LANE)
    hp = _round_up(hidden_size, LANE)
    op = _round_up(output_size, LANE)

    def seg_flat(wseg_q):
        # (H, S, C) -> (C, S, H) -> zero-pad -> (Cp, S*Hp); column s*Hp + u
        # holds the weight of segment s, hidden unit u.
        t = jnp.transpose(wseg_q, (2, 1, 0))
        t = jnp.pad(t, ((0, cp - dim_context), (0, 0), (0, hp - hidden_size)))
        return t.reshape(cp, num_segments * hp)

    kernel_params = {
        "w1": _pad2d(w1_q.T, dp, hp),                       # (Dp, Hp)   bf16
        "b1": _pad2d(b1[None, :], 1, hp),                   # (1, Hp)    f32
        "ws1": seg_flat(ws1_q),                             # (Cp, S*Hp) bf16
        "w2": _pad2d(w2_q.T, hp, hp),                       # (Hp, Hp)   bf16
        "b2": _pad2d(b2[None, :], 1, hp),                   # (1, Hp)    f32
        "ws2": seg_flat(ws2_q),                             # (Cp, S*Hp) bf16
        "wc": _pad2d(wc_q.T, hp, op),                       # (Hp, Op)   bf16
        "bc": _pad2d(bc[None, :], 1, op),                   # (1, Op)    f32
    }
    ref_params = {
        "w1": w1_q.astype(jnp.float32), "b1": b1,
        "wseg1": ws1_q.astype(jnp.float32),
        "w2": w2_q.astype(jnp.float32), "b2": b2,
        "wseg2": ws2_q.astype(jnp.float32),
        "wc": wc_q.astype(jnp.float32), "bc": bc,
    }
    return {"kernel": kernel_params, "ref": ref_params,
            "output_size": output_size}


def reference_forward(x, context, params):
    """Pure-JAX reference matching the PyTorch semantics (f32 math on the
    same bf16-quantized weights/inputs the kernel consumes)."""
    p = params["ref"]
    xq = x.astype(jnp.bfloat16).astype(jnp.float32)
    cq = context.astype(jnp.bfloat16).astype(jnp.float32)

    def gate(y, wseg):
        d = jnp.einsum("bc,usc->bus", cq, wseg)                 # (B, U, S)
        idx = jnp.argmax(jnp.abs(d), axis=2)                    # (B, U)
        sel = jnp.take_along_axis(d, idx[..., None], axis=2)[..., 0]
        return y * jax.nn.sigmoid(sel)

    y1 = xq @ p["w1"].T + p["b1"]
    h1 = gate(y1, p["wseg1"])
    y2 = h1 @ p["w2"].T + p["b2"]
    h2 = gate(y2, p["wseg2"])
    return h2 @ p["wc"].T + p["bc"]


if __name__ == "__main__":
    # Small shapes consistent with the module's constructor.
    batch = 2
    input_size = 16
    output_size = 10
    hidden_size = 32
    num_segments = 4
    dim_context = 12
    sparsity = 0.5

    key = jax.random.PRNGKey(0)
    k_x, k_c, k_p = jax.random.split(key, 3)
    x = jax.random.normal(k_x, (batch, input_size), jnp.float32)
    context = jax.random.normal(k_c, (batch, dim_context), jnp.float32)
    params = init_params(k_p, input_size, output_size, hidden_size,
                         num_segments, dim_context, sparsity)

    out = dendritic_mlp_forward(x, context, params)
    out = jax.block_until_ready(out)

    ref = reference_forward(x, context, params)
    assert out.shape == (batch, output_size)
    err = jnp.max(jnp.abs(out - ref))
    assert jnp.allclose(out, ref, atol=1e-2, rtol=1e-2), f"mismatch: max abs err {err}"

    print("KERNEL_OK")
</pallas_src>

<mosaic_0001>
module attributes {stable_mosaic.version = 11 : i64} {
  func.func @dendritic_mlp_kernel(%arg0: i32, %arg1: memref<8x128xbf16, #tpu.memory_space<vmem>>, %arg2: memref<8x128xbf16, #tpu.memory_space<vmem>>, %arg3: memref<128x128xbf16, #tpu.memory_space<vmem>>, %arg4: memref<1x128xf32, #tpu.memory_space<vmem>>, %arg5: memref<128x512xbf16, #tpu.memory_space<vmem>>, %arg6: memref<128x128xbf16, #tpu.memory_space<vmem>>, %arg7: memref<1x128xf32, #tpu.memory_space<vmem>>, %arg8: memref<128x512xbf16, #tpu.memory_space<vmem>>, %arg9: memref<128x128xbf16, #tpu.memory_space<vmem>>, %arg10: memref<1x128xf32, #tpu.memory_space<vmem>>, %arg11: memref<8x128xf32, #tpu.memory_space<vmem>>) attributes {dimension_semantics = [#tpu.dimension_semantics<parallel>], iteration_bounds = array<i64: 1>, scalar_prefetch = 0 : i64, scratch_operands = 0 : i64, tpu.core_type = #tpu.core_type<tc>, window_params = [{transform_indices = @transform_0, window_bounds = array<i64: 8, 128>}, {transform_indices = @transform_1, window_bounds = array<i64: 8, 128>}, {pipeline_mode = #tpu.pipeline_mode<synchronous>, transform_indices = @transform_2, window_bounds = array<i64: 128, 128>}, {pipeline_mode = #tpu.pipeline_mode<synchronous>, transform_indices = @transform_3, window_bounds = array<i64: 1, 128>}, {pipeline_mode = #tpu.pipeline_mode<synchronous>, transform_indices = @transform_4, window_bounds = array<i64: 128, 512>}, {pipeline_mode = #tpu.pipeline_mode<synchronous>, transform_indices = @transform_5, window_bounds = array<i64: 128, 128>}, {pipeline_mode = #tpu.pipeline_mode<synchronous>, transform_indices = @transform_6, window_bounds = array<i64: 1, 128>}, {pipeline_mode = #tpu.pipeline_mode<synchronous>, transform_indices = @transform_7, window_bounds = array<i64: 128, 512>}, {pipeline_mode = #tpu.pipeline_mode<synchronous>, transform_indices = @transform_8, window_bounds = array<i64: 128, 128>}, {pipeline_mode = #tpu.pipeline_mode<synchronous>, transform_indices = @transform_9, window_bounds = array<i64: 1, 128>}, {transform_indices = @transform_10, window_bounds = array<i64: 8, 128>}]} {
    %c0 = arith.constant 0 : index
    %c0_0 = arith.constant 0 : index
    %0 = vector.load %arg1[%c0, %c0_0] : memref<8x128xbf16, #tpu.memory_space<vmem>>, vector<8x128xbf16>
    %c0_1 = arith.constant 0 : index
    %c0_2 = arith.constant 0 : index
    %1 = vector.load %arg2[%c0_1, %c0_2] : memref<8x128xbf16, #tpu.memory_space<vmem>>, vector<8x128xbf16>
    %c0_3 = arith.constant 0 : index
    %c0_4 = arith.constant 0 : index
    %2 = vector.load %arg3[%c0_3, %c0_4] : memref<128x128xbf16, #tpu.memory_space<vmem>>, vector<128x128xbf16>
    %cst = arith.constant dense<0.000000e+00> : vector<8x128xf32>
    %3 = tpu.matmul %0, %2, %cst {dimension_numbers = #tpu.dot_dimension_numbers<[1], [0], [0], [1], [0, 0, 1, 1], [], []>} : vector<8x128xbf16>, vector<128x128xbf16>, vector<8x128xf32> -> vector<8x128xf32>
    %c0_5 = arith.constant 0 : index
    %c0_6 = arith.constant 0 : index
    %4 = vector.load %arg4[%c0_5, %c0_6] : memref<1x128xf32, #tpu.memory_space<vmem>>, vector<1x128xf32>
    %5 = vector.broadcast %4 : vector<1x128xf32> to vector<8x128xf32>
    %6 = arith.addf %3, %5 : vector<8x128xf32>
    %c0_7 = arith.constant 0 : index
    %c0_8 = arith.constant 0 : index
    %7 = vector.load %arg5[%c0_7, %c0_8] : memref<128x512xbf16, #tpu.memory_space<vmem>>, vector<128x512xbf16>
    %cst_9 = arith.constant dense<0.000000e+00> : vector<8x512xf32>
    %8 = tpu.matmul %1, %7, %cst_9 {dimension_numbers = #tpu.dot_dimension_numbers<[1], [0], [0], [1], [0, 0, 1, 1], [], []>} : vector<8x128xbf16>, vector<128x512xbf16>, vector<8x512xf32> -> vector<8x512xf32>
    %9 = vector.extract_strided_slice %8 {offsets = [0, 0], sizes = [8, 128], strides = [1, 1]} : vector<8x512xf32> to vector<8x128xf32>
    %10 = math.absf %9 : vector<8x128xf32>
    %11 = vector.extract_strided_slice %8 {offsets = [0, 128], sizes = [8, 128], strides = [1, 1]} : vector<8x512xf32> to vector<8x128xf32>
    %12 = math.absf %11 : vector<8x128xf32>
    %13 = arith.cmpf ogt, %12, %10 : vector<8x128xf32>
    %14 = arith.select %13, %11, %9 : vector<8x128xi1>, vector<8x128xf32>
    %15 = arith.select %13, %12, %10 : vector<8x128xi1>, vector<8x128xf32>
    %16 = vector.extract_strided_slice %8 {offsets = [0, 256], sizes = [8, 128], strides = [1, 1]} : vector<8x512xf32> to vector<8x128xf32>
    %17 = math.absf %16 : vector<8x128xf32>
    %18 = arith.cmpf ogt, %17, %15 : vector<8x128xf32>
    %19 = arith.select %18, %16, %14 : vector<8x128xi1>, vector<8x128xf32>
    %20 = arith.select %18, %17, %15 : vector<8x128xi1>, vector<8x128xf32>
    %21 = vector.extract_strided_slice %8 {offsets = [0, 384], sizes = [8, 128], strides = [1, 1]} : vector<8x512xf32> to vector<8x128xf32>
    %22 = math.absf %21 : vector<8x128xf32>
    %23 = arith.cmpf ogt, %22, %20 : vector<8x128xf32>
    %24 = arith.select %23, %21, %19 : vector<8x128xi1>, vector<8x128xf32>
    %25 = arith.negf %24 : vector<8x128xf32>
    %26 = math.exp %25 : vector<8x128xf32>
    %cst_10 = arith.constant 1.000000e+00 : f32
    %27 = vector.broadcast %cst_10 : f32 to vector<8x128xf32>
    %28 = arith.addf %27, %26 : vector<8x128xf32>
    %29 = arith.divf %27, %28 : vector<8x128xf32>
    %30 = arith.mulf %6, %29 : vector<8x128xf32>
    %31 = arith.truncf %30 : vector<8x128xf32> to vector<8x128xbf16>
    %c0_11 = arith.constant 0 : index
    %c0_12 = arith.constant 0 : index
    %32 = vector.load %arg6[%c0_11, %c0_12] : memref<128x128xbf16, #tpu.memory_space<vmem>>, vector<128x128xbf16>
    %cst_13 = arith.constant dense<0.000000e+00> : vector<8x128xf32>
    %33 = tpu.matmul %31, %32, %cst_13 {dimension_numbers = #tpu.dot_dimension_numbers<[1], [0], [0], [1], [0, 0, 1, 1], [], []>} : vector<8x128xbf16>, vector<128x128xbf16>, vector<8x128xf32> -> vector<8x128xf32>
    %c0_14 = arith.constant 0 : index
    %c0_15 = arith.constant 0 : index
    %34 = vector.load %arg7[%c0_14, %c0_15] : memref<1x128xf32, #tpu.memory_space<vmem>>, vector<1x128xf32>
    %35 = vector.broadcast %34 : vector<1x128xf32> to vector<8x128xf32>
    %36 = arith.addf %33, %35 : vector<8x128xf32>
    %c0_16 = arith.constant 0 : index
    %c0_17 = arith.constant 0 : index
    %37 = vector.load %arg8[%c0_16, %c0_17] : memref<128x512xbf16, #tpu.memory_space<vmem>>, vector<128x512xbf16>
    %cst_18 = arith.constant dense<0.000000e+00> : vector<8x512xf32>
    %38 = tpu.matmul %1, %37, %cst_18 {dimension_numbers = #tpu.dot_dimension_numbers<[1], [0], [0], [1], [0, 0, 1, 1], [], []>} : vector<8x128xbf16>, vector<128x512xbf16>, vector<8x512xf32> -> vector<8x512xf32>
    %39 = vector.extract_strided_slice %38 {offsets = [0, 0], sizes = [8, 128], strides = [1, 1]} : vector<8x512xf32> to vector<8x128xf32>
    %40 = math.absf %39 : vector<8x128xf32>
    %41 = vector.extract_strided_slice %38 {offsets = [0, 128], sizes = [8, 128], strides = [1, 1]} : vector<8x512xf32> to vector<8x128xf32>
    %42 = math.absf %41 : vector<8x128xf32>
    %43 = arith.cmpf ogt, %42, %40 : vector<8x128xf32>
    %44 = arith.select %43, %41, %39 : vector<8x128xi1>, vector<8x128xf32>
    %45 = arith.select %43, %42, %40 : vector<8x128xi1>, vector<8x128xf32>
    %46 = vector.extract_strided_slice %38 {offsets = [0, 256], sizes = [8, 128], strides = [1, 1]} : vector<8x512xf32> to vector<8x128xf32>
    %47 = math.absf %46 : vector<8x128xf32>
    %48 = arith.cmpf ogt, %47, %45 : vector<8x128xf32>
    %49 = arith.select %48, %46, %44 : vector<8x128xi1>, vector<8x128xf32>
    %50 = arith.select %48, %47, %45 : vector<8x128xi1>, vector<8x128xf32>
    %51 = vector.extract_strided_slice %38 {offsets = [0, 384], sizes = [8, 128], strides = [1, 1]} : vector<8x512xf32> to vector<8x128xf32>
    %52 = math.absf %51 : vector<8x128xf32>
    %53 = arith.cmpf ogt, %52, %50 : vector<8x128xf32>
    %54 = arith.select %53, %51, %49 : vector<8x128xi1>, vector<8x128xf32>
    %55 = arith.negf %54 : vector<8x128xf32>
    %56 = math.exp %55 : vector<8x128xf32>
    %cst_19 = arith.constant 1.000000e+00 : f32
    %57 = vector.broadcast %cst_19 : f32 to vector<8x128xf32>
    %58 = arith.addf %57, %56 : vector<8x128xf32>
    %59 = arith.divf %57, %58 : vector<8x128xf32>
    %60 = arith.mulf %36, %59 : vector<8x128xf32>
    %61 = arith.truncf %60 : vector<8x128xf32> to vector<8x128xbf16>
    %c0_20 = arith.constant 0 : index
    %c0_21 = arith.constant 0 : index
    %62 = vector.load %arg9[%c0_20, %c0_21] : memref<128x128xbf16, #tpu.memory_space<vmem>>, vector<128x128xbf16>
    %cst_22 = arith.constant dense<0.000000e+00> : vector<8x128xf32>
    %63 = tpu.matmul %61, %62, %cst_22 {dimension_numbers = #tpu.dot_dimension_numbers<[1], [0], [0], [1], [0, 0, 1, 1], [], []>} : vector<8x128xbf16>, vector<128x128xbf16>, vector<8x128xf32> -> vector<8x128xf32>
    %c0_23 = arith.constant 0 : index
    %c0_24 = arith.constant 0 : index
    %64 = vector.load %arg10[%c0_23, %c0_24] : memref<1x128xf32, #tpu.memory_space<vmem>>, vector<1x128xf32>
    %65 = vector.broadcast %64 : vector<1x128xf32> to vector<8x128xf32>
    %66 = arith.addf %63, %65 : vector<8x128xf32>
    %c0_25 = arith.constant 0 : index
    %c0_26 = arith.constant 0 : index
    %67 = vector.load %arg11[%c0_25, %c0_26] : memref<8x128xf32, #tpu.memory_space<vmem>>, vector<8x128xf32>
    tpu.vector_store %arg11[%c0_25, %c0_26], %66 {strides = array<i32>} : memref<8x128xf32, #tpu.memory_space<vmem>>, vector<8x128xf32>,
    return
  }
  func.func @transform_0(%arg0: i32) -> (i32, i32) {
    %c0_i32 = arith.constant 0 : i32
    %c0_i32_0 = arith.constant 0 : i32
    return %arg0, %c0_i32 : i32, i32
  }
  func.func @transform_1(%arg0: i32) -> (i32, i32) {
    %c0_i32 = arith.constant 0 : i32
    %c0_i32_0 = arith.constant 0 : i32
    return %arg0, %c0_i32 : i32, i32
  }
  func.func @transform_2(%arg0: i32) -> (i32, i32) {
    %c0_i32 = arith.constant 0 : i32
    %c0_i32_0 = arith.constant 0 : i32
    %c0_i32_1 = arith.constant 0 : i32
    return %c0_i32, %c0_i32_0 : i32, i32
  }
  func.func @transform_3(%arg0: i32) -> (i32, i32) {
    %c0_i32 = arith.constant 0 : i32
    %c0_i32_0 = arith.constant 0 : i32
    %c0_i32_1 = arith.constant 0 : i32
    return %c0_i32, %c0_i32_0 : i32, i32
  }
  func.func @transform_4(%arg0: i32) -> (i32, i32) {
    %c0_i32 = arith.constant 0 : i32
    %c0_i32_0 = arith.constant 0 : i32
    %c0_i32_1 = arith.constant 0 : i32
    return %c0_i32, %c0_i32_0 : i32, i32
  }
  func.func @transform_5(%arg0: i32) -> (i32, i32) {
    %c0_i32 = arith.constant 0 : i32
    %c0_i32_0 = arith.constant 0 : i32
    %c0_i32_1 = arith.constant 0 : i32
    return %c0_i32, %c0_i32_0 : i32, i32
  }
  func.func @transform_6(%arg0: i32) -> (i32, i32) {
    %c0_i32 = arith.constant 0 : i32
    %c0_i32_0 = arith.constant 0 : i32
    %c0_i32_1 = arith.constant 0 : i32
    return %c0_i32, %c0_i32_0 : i32, i32
  }
  func.func @transform_7(%arg0: i32) -> (i32, i32) {
    %c0_i32 = arith.constant 0 : i32
    %c0_i32_0 = arith.constant 0 : i32
    %c0_i32_1 = arith.constant 0 : i32
    return %c0_i32, %c0_i32_0 : i32, i32
  }
  func.func @transform_8(%arg0: i32) -> (i32, i32) {
    %c0_i32 = arith.constant 0 : i32
    %c0_i32_0 = arith.constant 0 : i32
    %c0_i32_1 = arith.constant 0 : i32
    return %c0_i32, %c0_i32_0 : i32, i32
  }
  func.func @transform_9(%arg0: i32) -> (i32, i32) {
    %c0_i32 = arith.constant 0 : i32
    %c0_i32_0 = arith.constant 0 : i32
    %c0_i32_1 = arith.constant 0 : i32
    return %c0_i32, %c0_i32_0 : i32, i32
  }
  func.func @transform_10(%arg0: i32) -> (i32, i32) {
    %c0_i32 = arith.constant 0 : i32
    %c0_i32_0 = arith.constant 0 : i32
    return %arg0, %c0_i32 : i32, i32
  }
}

</mosaic_0001>

<bundles_post_ra>
// kernel: _forward_padded.1
= control target key start
LH: loop header
LB: loop body
LE: loop exit
PB: predicated region body
PF: predicated region fallthrough
CT: control target
= control target key end

     0   :  { %15 = vsyncpa [#allocation3], 0  ;;  %s1818_s0 = inlined_call_operand.hbm [shape: bf16[8,128], index: 0, kind: input, shape index: {}]   ;;  %s1819_s1 = inlined_call_operand.hbm [shape: bf16[8,128], index: 1, kind: input, shape index: {}]   ;;  %s1820_s2 = inlined_call_operand.hbm [shape: bf16[128,128], index: 2, kind: input, shape index: {}]   ;;  %s1821_s3 = inlined_call_operand.vmem [shape: f32[1,128], index: 3, kind: input, shape index: {}]   ;;  %s1822_s4 = inlined_call_operand.hbm [shape: bf16[128,512], index: 4, kind: input, shape index: {}]   ;;  %s1823_s5 = inlined_call_operand.hbm [shape: bf16[128,128], index: 5, kind: input, shape index: {}]   ;;  %s1824_s6 = inlined_call_operand.vmem [shape: f32[1,128], index: 6, kind: input, shape index: {}]   ;;  %s1825_s7 = inlined_call_operand.hbm [shape: bf16[128,512], index: 7, kind: input, shape index: {}]   ;;  %s1826_s8 = inlined_call_operand.hbm [shape: bf16[128,128], index: 8, kind: input, shape index: {}]   ;;  %s1827_s9 = inlined_call_operand.vmem [shape: f32[1,128], index: 9, kind: input, shape index: {}]   ;;  %s1828_s10 = inlined_call_operand.hbm [shape: f32[8,128], index: 10, kind: output, shape index: {}]  }
   0x1   :  { %16 = vsyncpa [#allocation6], 0 }
   0x2   :  { %17 = vsyncpa [#allocation9], 0 }
   0x3   :  { %18 = vsyncpa [#allocation12], 0 }
   0x4   :  { %19 = vsyncpa [#allocation4], 0  ;;  %s1579_s13 = smov [#allocation5]   ;;  %s1580_s15 = smov [#allocation8]  }
   0x5   :  { %s36_s14 = sshll.u32 %s1579_s13, 4  ;;  %s59_s16 = sshll.u32 %s1580_s15, 4  ;;  %s37_s14 = int_to_ptr.vmem [resolvable:$true] %s36_s14  ;;  %s1649_s16 = int_to_ptr.vmem [resolvable:$true] %s59_s16 }
   0x6   :  { %s1393_s19 = scalar_lea.hbm %s1819_s1, 64 }
   0x7   :  { %p1394_p0 = scmp.ne.s32.totalorder %s1819_s1, %s1393_s19  ;;  %p1397_p1 = scmp.lt.u32.totalorder %s1393_s19, %s1819_s1 }
   0x9   :  { %p1399_p2 = pnand %p1397_p1, %p1394_p0 }
   0xb   :  { %1402 = shalt.err (!%p1399_p2)
}
   0xc   :  { %s1403_s24 = scalar_lea.vmem %s37_s14, 64  ;;  %p1408_p4 = scmp.lt.s32.totalorder %s37_s14, %s37_s14 }
   0xd   :  { %p1404_p3 = scmp.ne.s32.totalorder %s37_s14, %s1403_s24  ;;  %p1409_p5 = scmp.lt.s32.totalorder %s1403_s24, %s1403_s24 }
   0xf   :  { %p1410_p6 = por %p1409_p5, %p1408_p4 }
  0x11   :  { %p1411_p7 = pnand %p1410_p6, %p1404_p3 }
  0x13   :  { %1414 = shalt.err (!%p1411_p7)
}
  0x14   :  { %39 = dma.hbm_to_vmem [thread:$0]  %s1819_s1, 64, %s37_s14, [#allocation6]  }
  0x15   :  { %s1415_s29 = scalar_lea.hbm %s1822_s4, 4096 }
  0x16   :  { %p1416_p8 = scmp.ne.s32.totalorder %s1822_s4, %s1415_s29  ;;  %p1419_p9 = scmp.lt.u32.totalorder %s1415_s29, %s1822_s4 }
  0x18   :  { %p1421_p10 = pnand %p1419_p9, %p1416_p8 }
  0x1a   :  { %1424 = shalt.err (!%p1421_p10)
}
  0x1b   :  { %s1425_s15 = scalar_lea.vmem %s1649_s16, 4096  ;;  %p1430_p12 = scmp.lt.s32.totalorder %s1649_s16, %s1649_s16 }
  0x1c   :  { %p1426_p11 = scmp.ne.s32.totalorder %s1649_s16, %s1425_s15  ;;  %p1431_p13 = scmp.lt.s32.totalorder %s1425_s15, %s1425_s15 }
  0x1e   :  { %p1432_p0 = por %p1431_p13, %p1430_p12 }
  0x20   :  { %p1433_p1 = pnand %p1432_p0, %p1426_p11 }
  0x22   :  { %1436 = shalt.err (!%p1433_p1)
}
  0x23   :  { %s1581_s1 = smov 256   ;;  %s1582_s14 = smov 16  }
  0x24   :  { %65 = dma.hbm_to_vmem [thread:$0]  %s1822_s4, 4096, %s1649_s16, [#allocation9], %s1581_s1, %s1581_s1, %s1582_s14  }
  0x25   :  { %s1583_s19 = smov [#allocation11]   ;;  %s1584_s21 = smov [#allocation2]  }
  0x26   :  { %s85_s20 = sshll.u32 %s1583_s19, 4  ;;  %s26_s22 = sshll.u32 %s1584_s21, 4  ;;  %s86_s20 = int_to_ptr.vmem [resolvable:$true] %s85_s20  ;;  %s27_s22 = int_to_ptr.vmem [resolvable:$true] %s26_s22 }
  0x27   :  { %s1437_s25 = scalar_lea.hbm %s1825_s7, 4096 }
  0x28   :  { %p1438_p2 = scmp.ne.s32.totalorder %s1825_s7, %s1437_s25  ;;  %p1441_p3 = scmp.lt.u32.totalorder %s1437_s25, %s1825_s7 }
  0x2a   :  { %p1443_p4 = pnand %p1441_p3, %p1438_p2 }
  0x2c   :  { %1446 = shalt.err (!%p1443_p4)
}
  0x2d   :  { %s1447_s4 = scalar_lea.vmem %s86_s20, 4096  ;;  %p1452_p6 = scmp.lt.s32.totalorder %s86_s20, %s86_s20 }
  0x2e   :  { %p1448_p5 = scmp.ne.s32.totalorder %s86_s20, %s1447_s4  ;;  %p1453_p7 = scmp.lt.s32.totalorder %s1447_s4, %s1447_s4 }
  0x30   :  { %p1454_p8 = por %p1453_p7, %p1452_p6 }
  0x32   :  { %p1455_p9 = pnand %p1454_p8, %p1448_p5 }
  0x34   :  { %1458 = shalt.err (!%p1455_p9)
}
  0x35   :  { %91 = dma.hbm_to_vmem [thread:$0]  %s1825_s7, 4096, %s86_s20, [#allocation12], %s1581_s1, %s1581_s1, %s1582_s14  }
  0x36   :  { %s1459_s13 = scalar_lea.hbm %s1818_s0, 64 }
  0x37   :  { %p1460_p10 = scmp.ne.s32.totalorder %s1818_s0, %s1459_s13  ;;  %p1463_p11 = scmp.lt.u32.totalorder %s1459_s13, %s1818_s0 }
  0x39   :  { %p1465_p12 = pnand %p1463_p11, %p1460_p10 }
  0x3b   :  { %1468 = shalt.err (!%p1465_p12)
}
  0x3c   :  { %s1469_s21 = scalar_lea.vmem %s27_s22, 64  ;;  %p1474_p0 = scmp.lt.s32.totalorder %s27_s22, %s27_s22 }
  0x3d   :  { %p1470_p13 = scmp.ne.s32.totalorder %s27_s22, %s1469_s21  ;;  %p1475_p1 = scmp.lt.s32.totalorder %s1469_s21, %s1469_s21 }
  0x3f   :  { %p1476_p2 = por %p1475_p1, %p1474_p0 }
  0x41   :  { %p1477_p3 = pnand %p1476_p2, %p1470_p13 }
  0x43   :  { %1480 = shalt.err (!%p1477_p3)
}
  0x44   :  { %29 = dma.hbm_to_vmem [thread:$0]  %s1818_s0, 64, %s27_s22, [#allocation3]  }
  0x45   :  { %s1585_s14 = smov [#allocation7]   ;;  %s1481_s25 = scalar_lea.hbm %s1820_s2, 1024 }
  0x46   :  { %s45_s20 = sshll.u32 %s1585_s14, 4  ;;  %p1482_p4 = scmp.ne.s32.totalorder %s1820_s2, %s1481_s25  ;;  %s46_s20 = int_to_ptr.vmem [resolvable:$true] %s45_s20 }
  0x47   :  { %p1485_p5 = scmp.lt.u32.totalorder %s1481_s25, %s1820_s2 }
  0x49   :  { %p1487_p6 = pnand %p1485_p5, %p1482_p4 }
  0x4b   :  { %1490 = shalt.err (!%p1487_p6)
}
  0x4c   :  { %s1491_s4 = scalar_lea.vmem %s46_s20, 1024  ;;  %p1496_p8 = scmp.lt.s32.totalorder %s46_s20, %s46_s20 }
  0x4d   :  { %p1492_p7 = scmp.ne.s32.totalorder %s46_s20, %s1491_s4  ;;  %p1497_p9 = scmp.lt.s32.totalorder %s1491_s4, %s1491_s4 }
  0x4f   :  { %p1498_p10 = por %p1497_p9, %p1496_p8 }
  0x51   :  { %p1499_p11 = pnand %p1498_p10, %p1492_p7 }
  0x53   :  { %1502 = shalt.err (!%p1499_p11)
}
  0x54   :  { %s1586_s0 = smov 64   ;;  %s1587_s22 = smov 4  }
  0x55   :  { %51 = dma.hbm_to_vmem [thread:$0]  %s1820_s2, 1024, %s46_s20, [#allocation6], %s1586_s0, %s1586_s0, %s1587_s22  }
  0x56   :  { %s1588_s11 = smov [#allocation10]   ;;  %s1589_s13 = smov [#allocation13]  }
  0x57   :  { %s71_s12 = sshll.u32 %s1588_s11, 4  ;;  %s97_s15 = sshll.u32 %s1589_s13, 4  ;;  %s72_s12 = int_to_ptr.vmem [resolvable:$true] %s71_s12  ;;  %s98_s15 = int_to_ptr.vmem [resolvable:$true] %s97_s15 }
  0x58   :  { %s1503_s19 = scalar_lea.hbm %s1823_s5, 1024 }
  0x59   :  { %p1504_p12 = scmp.ne.s32.totalorder %s1823_s5, %s1503_s19  ;;  %p1507_p13 = scmp.lt.u32.totalorder %s1503_s19, %s1823_s5 }
  0x5b   :  { %p1509_p0 = pnand %p1507_p13, %p1504_p12 }
  0x5d   :  { %1512 = shalt.err (!%p1509_p0)
}
  0x5e   :  { %s1513_s2 = scalar_lea.vmem %s72_s12, 1024  ;;  %p1518_p2 = scmp.lt.s32.totalorder %s72_s12, %s72_s12 }
  0x5f   :  { %p1514_p1 = scmp.ne.s32.totalorder %s72_s12, %s1513_s2  ;;  %p1519_p3 = scmp.lt.s32.totalorder %s1513_s2, %s1513_s2 }
  0x61   :  { %p1520_p4 = por %p1519_p3, %p1518_p2 }
  0x63   :  { %p1521_p5 = pnand %p1520_p4, %p1514_p1 }
  0x65   :  { %1524 = shalt.err (!%p1521_p5)
}
  0x66   :  { %77 = dma.hbm_to_vmem [thread:$0]  %s1823_s5, 1024, %s72_s12, [#allocation9], %s1586_s0, %s1586_s0, %s1587_s22  }
  0x67   :  { %s1525_s26 = scalar_lea.hbm %s1826_s8, 1024 }
  0x68   :  { %p1526_p6 = scmp.ne.s32.totalorder %s1826_s8, %s1525_s26  ;;  %p1529_p7 = scmp.lt.u32.totalorder %s1525_s26, %s1826_s8 }
  0x6a   :  { %p1531_p8 = pnand %p1529_p7, %p1526_p6 }
  0x6c   :  { %1534 = shalt.err (!%p1531_p8)
}
  0x6d   :  { %s1535_s16 = scalar_lea.vmem %s98_s15, 1024  ;;  %p1540_p10 = scmp.lt.s32.totalorder %s98_s15, %s98_s15 }
  0x6e   :  { %p1536_p9 = scmp.ne.s32.totalorder %s98_s15, %s1535_s16  ;;  %p1541_p11 = scmp.lt.s32.totalorder %s1535_s16, %s1535_s16 }
  0x70   :  { %p1542_p12 = por %p1541_p11, %p1540_p10 }
  0x72   :  { %p1543_p13 = pnand %p1542_p12, %p1536_p9 }
  0x74   :  { %1546 = shalt.err (!%p1543_p13)
}
  0x75   :  { %103 = dma.hbm_to_vmem [thread:$0]  %s1826_s8, 1024, %s98_s15, [#allocation12], %s1586_s0, %s1586_s0, %s1587_s22  }
  0x76   :  { %1569 = dma.done.wait [#allocation3], 64  }
  0x77   :  { %1570 = vsyncadd [#allocation3], 4294967232 }
  0x78   :  { %1571 = dma.done.wait [#allocation6], 1088  }
  0x79   :  { %1572 = vsyncadd [#allocation6], 4294966208 }
  0x7a   :  { %1573 = dma.done.wait [#allocation9], 5120  }
  0x7b   :  { %1574 = vsyncadd [#allocation9], 4294962176 }
  0x7c   :  { %1575 = dma.done.wait [#allocation12], 5120  }
  0x7d   :  { %1576 = vsyncadd [#allocation12], 4294962176  ;;  %v1590_v0 = vmov 0.0   ;;  %vm1591_vm0 = vmmov 0   ;;  %v1592_v1 = vmov 0   ;;  %v1265_v2 = vld [vmem:[#allocation7] sm:$0xff]  }
  0x7e   :  { %1190 = vmatprep.subr.bf16.mxu0 %v1590_v0  ;;  %1206 = vmatprep.mubr.msk.bf16.mxu0 %vm1591_vm0, %v1590_v0  ;;  %v1266_v3 = vld [vmem:[#allocation7 + $0x8] sm:$0xff]   ;;  %v1267_v4 = vld [vmem:[#allocation7 + $0x10] sm:$0xff]   ;;  %v1268_v7 = vld [vmem:[#allocation7 + $0x18] sm:$0xff]   ;;  %s1593_s13 = smov [#allocation14]  }
  0x7f   :  { %465 = vmatprep.mubr.bf16.mxu1 %v1592_v1  ;;  %1191 = vmatpush3.bf16.msra.mxu0 %v1265_v2  ;;  %v1272_v5 = vld [vmem:[#allocation8 + $0x4] ss:$16 sps:$4 sm:$0xff]   ;;  %v1274_v6 = vld [vmem:[#allocation8] ss:$16 sps:$4 sm:$0xff]   ;;  %v1270_v14 = vld [vmem:[#allocation7 + $0x28] sm:$0xff]   ;;  %s1058_s15 = sshll.u32 %s1593_s13, 4  ;;  %s1059_s15 = int_to_ptr.vmem [resolvable:$true] %s1058_s15 }
  0x80   :  { %1192 = vmatprep.subr.bf16.mxu0 %v1590_v0  ;;  %433 = vmatprep.subr.bf16.mxu1 %v1272_v5  ;;  %v1276_v8 = vld [vmem:[#allocation8 + $0x24] ss:$16 sps:$4 sm:$0xff]   ;;  %v1278_v9 = vld [vmem:[#allocation8 + $0x20] ss:$16 sps:$4 sm:$0xff]   ;;  %v1275_v20 = vld [vmem:[#allocation7 + $0x38] sm:$0xff]   ;;  %s1547_s17 = scalar_lea.vmem %s1059_s15, 128  ;;  %p1552_p1 = scmp.lt.s32.totalorder %s1059_s15, %s1059_s15 }
  0x81   :  { %434 = vmatpush1.bf16.msra.mxu1 %v1274_v6  ;;  %v1282_v10 = vld [vmem:[#allocation8 + $0x44] ss:$16 sps:$4 sm:$0xff]   ;;  %v1284_v12 = vld [vmem:[#allocation8 + $0x40] ss:$16 sps:$4 sm:$0xff]   ;;  %v1281_v21 = vld [vmem:[#allocation8 + $0xc] ss:$16 sps:$4 sm:$0xff]   ;;  %p1548_p0 = scmp.ne.s32.totalorder %s1059_s15, %s1547_s17  ;;  %p1553_p2 = scmp.lt.s32.totalorder %s1547_s17, %s1547_s17 }
  0x82   :  { %435 = vmatprep.subr.bf16.mxu1 %v1276_v8  ;;  %v1269_v11 = vld [vmem:[#allocation7 + $0x20] sm:$0xff]   ;;  %v1271_v17 = vld [vmem:[#allocation7 + $0x30] sm:$0xff]   ;;  %v128_v24 = vld [vmem:[#allocation2] sm:$0xf] }
  0x83   :  { %1193 = vmatpush3.bf16.msra.mxu0 %v1266_v3  ;;  %v1288_v13 = vld [vmem:[#allocation8 + $0x64] ss:$16 sps:$4 sm:$0xff]   ;;  %v1290_v15 = vld [vmem:[#allocation8 + $0x60] ss:$16 sps:$4 sm:$0xff]   ;;  %v1279_v25 = vld [vmem:[#allocation8 + $0x8] ss:$16 sps:$4 sm:$0xff]   ;;  %p1554_p3 = por %p1553_p2, %p1552_p1 }
  0x84   :  { %1194 = vmatprep.subr.bf16.mxu0 %v1590_v0  ;;  %v1294_v16 = vld [vmem:[#allocation8 + $0x84] ss:$16 sps:$4 sm:$0xff]   ;;  %v1296_v18 = vld [vmem:[#allocation8 + $0x80] ss:$16 sps:$4 sm:$0xff]   ;;  %v1287_v26 = vld [vmem:[#allocation8 + $0x2c] ss:$16 sps:$4 sm:$0xff]  }
  0x85   :  { %436 = vmatpush1.bf16.msra.mxu1 %v1278_v9  ;;  %v1300_v19 = vld [vmem:[#allocation8 + $0xa4] ss:$16 sps:$4 sm:$0xff]   ;;  %v1302_v22 = vld [vmem:[#allocation8 + $0xa0] ss:$16 sps:$4 sm:$0xff]   ;;  %v1285_v29 = vld [vmem:[#allocation8 + $0x28] ss:$16 sps:$4 sm:$0xff]   ;;  %p1555_p4 = pnand %p1554_p3, %p1548_p0 }
  0x86   :  { %437 = vmatprep.subr.bf16.mxu1 %v1282_v10  ;;  %v1306_v23 = vld [vmem:[#allocation8 + $0xc4] ss:$16 sps:$4 sm:$0xff]   ;;  %v1308_v27 = vld [vmem:[#allocation8 + $0xc0] ss:$16 sps:$4 sm:$0xff]   ;;  %v1293_v31 = vld [vmem:[#allocation8 + $0x4c] ss:$16 sps:$4 sm:$0xff]  }
  0x87   :  { %1195 = vmatpush3.bf16.msra.mxu0 %v1267_v4  ;;  %v1312_v28 = vld [vmem:[#allocation8 + $0xe4] ss:$16 sps:$4 sm:$0xff]   ;;  %v1314_v30 = vld [vmem:[#allocation8 + $0xe0] ss:$16 sps:$4 sm:$0xff]   ;;  %v1291_v32 = vld [vmem:[#allocation8 + $0x48] ss:$16 sps:$4 sm:$0xff]  }
  0x88   :  { %1196 = vmatprep.subr.bf16.mxu0 %v1590_v0  ;;  %v1760_v33 = vld [vmem:[#allocation5] sm:$0xf]  ;;  %v1297_v35 = vld [vmem:[#allocation8 + $0x68] ss:$16 sps:$4 sm:$0xff]   ;;  %v1321_v44 = vld [vmem:[#allocation10] sm:$0xff]  }
  0x89   :  { %438 = vmatpush1.bf16.msra.mxu1 %v1284_v12  ;;  %v1299_v34 = vld [vmem:[#allocation8 + $0x6c] ss:$16 sps:$4 sm:$0xff]   ;;  %v1303_v37 = vld [vmem:[#allocation8 + $0x88] ss:$16 sps:$4 sm:$0xff]   ;;  %v1323_v46 = vld [vmem:[#allocation10 + $0x10] sm:$0xff]  }
  0x8a   :  { %439 = vmatprep.subr.bf16.mxu1 %v1288_v13  ;;  %v1305_v36 = vld [vmem:[#allocation8 + $0x8c] ss:$16 sps:$4 sm:$0xff]   ;;  %v1309_v39 = vld [vmem:[#allocation8 + $0xa8] ss:$16 sps:$4 sm:$0xff]   ;;  %v1325_v48 = vld [vmem:[#allocation10 + $0x20] sm:$0xff]  }
  0x8b   :  { %1197 = vmatpush3.bf16.msra.mxu0 %v1268_v7  ;;  %v1311_v38 = vld [vmem:[#allocation8 + $0xac] ss:$16 sps:$4 sm:$0xff]   ;;  %v1315_v41 = vld [vmem:[#allocation8 + $0xc8] ss:$16 sps:$4 sm:$0xff]   ;;  %v1328_v50 = vld [vmem:[#allocation11] ss:$16 sps:$4 sm:$0xff]  }
  0x8c   :  { %1198 = vmatprep.subr.bf16.mxu0 %v1590_v0  ;;  %v1317_v40 = vld [vmem:[#allocation8 + $0xcc] ss:$16 sps:$4 sm:$0xff]   ;;  %v1318_v43 = vld [vmem:[#allocation8 + $0xe8] ss:$16 sps:$4 sm:$0xff]   ;;  %v1330_v51 = vld [vmem:[#allocation11 + $0x4] ss:$16 sps:$4 sm:$0xff]  }
  0x8d   :  { %440 = vmatpush1.bf16.msra.mxu1 %v1290_v15  ;;  %v1320_v42 = vld [vmem:[#allocation8 + $0xec] ss:$16 sps:$4 sm:$0xff]   ;;  %v1334_v52 = vld [vmem:[#allocation11 + $0x24] ss:$16 sps:$4 sm:$0xff]   ;;  %v1332_v54 = vld [vmem:[#allocation11 + $0x20] ss:$16 sps:$4 sm:$0xff]  }
  0x8e   :  { %441 = vmatprep.subr.bf16.mxu1 %v1294_v16  ;;  %v1322_v45 = vld [vmem:[#allocation10 + $0x8] sm:$0xff]   ;;  %v1324_v47 = vld [vmem:[#allocation10 + $0x18] sm:$0xff]   ;;  %v1327_v53 = vld [vmem:[#allocation10 + $0x30] sm:$0xff]  }
  0x8f   :  { %1199 = vmatpush3.bf16.msra.mxu0 %v1269_v11  ;;  %v1326_v49 = vld [vmem:[#allocation10 + $0x28] sm:$0xff]   ;;  %v1331_v55 = vld [vmem:[#allocation10 + $0x38] sm:$0xff]   ;;  %v1340_v57 = vld [vmem:[#allocation11 + $0x44] ss:$16 sps:$4 sm:$0xff]  }
  0x90   :  { %1200 = vmatprep.subr.bf16.mxu0 %v1590_v0  ;;  %v1337_v56 = vld [vmem:[#allocation11 + $0xc] ss:$16 sps:$4 sm:$0xff]   ;;  %v1338_v58 = vld [vmem:[#allocation11 + $0x40] ss:$16 sps:$4 sm:$0xff]   ;;  %v1346_v60 = vld [vmem:[#allocation11 + $0x64] ss:$16 sps:$4 sm:$0xff]  }
  0x91   :  { %442 = vmatpush1.bf16.msra.mxu1 %v1296_v18  ;;  %v1344_v59 = vld [vmem:[#allocation11 + $0x60] ss:$16 sps:$4 sm:$0xff]   ;;  %v1352_v62 = vld [vmem:[#allocation11 + $0x84] ss:$16 sps:$4 sm:$0xff]  }
  0x92   :  { %443 = vmatprep.subr.bf16.mxu1 %v1300_v19  ;;  %v1350_v61 = vld [vmem:[#allocation11 + $0x80] ss:$16 sps:$4 sm:$0xff]   ;;  %v1358_v2 = vld [vmem:[#allocation11 + $0xa4] ss:$16 sps:$4 sm:$0xff]  }
  0x93   :  { %1201 = vmatpush3.bf16.msra.mxu0 %v1270_v14  ;;  %v1356_v63 = vld [vmem:[#allocation11 + $0xa0] ss:$16 sps:$4 sm:$0xff]   ;;  %v1364_v4 = vld [vmem:[#allocation11 + $0xc4] ss:$16 sps:$4 sm:$0xff]  }
  0x94   :  { %1202 = vmatprep.subr.bf16.mxu0 %v1590_v0  ;;  %v1362_v3 = vld [vmem:[#allocation11 + $0xc0] ss:$16 sps:$4 sm:$0xff]   ;;  %v1370_v6 = vld [vmem:[#allocation11 + $0xe4] ss:$16 sps:$4 sm:$0xff]  }
  0x95   :  { %444 = vmatpush1.bf16.msra.mxu1 %v1302_v22  ;;  %v1368_v5 = vld [vmem:[#allocation11 + $0xe0] ss:$16 sps:$4 sm:$0xff]  }
  0x96   :  { %445 = vmatprep.subr.bf16.mxu1 %v1306_v23 }
  0x97   :  { %1203 = vmatpush3.bf16.msra.mxu0 %v1271_v17 }
  0x98   :  { %1204 = vmatprep.subr.bf16.mxu0 %v1590_v0 }
  0x99   :  { %446 = vmatpush1.bf16.msra.mxu1 %v1308_v27 }
  0x9a   :  { %447 = vmatprep.subr.bf16.mxu1 %v1312_v28 }
  0x9b   :  { %1205 = vmatpush3.bf16.msra.mxu0 %v1275_v20 }
  0x9c   :  { %474 = vmatprep.subr.bf16.mxu0 %v1281_v21 }
  0x9d   :  { %448 = vmatpush1.bf16.msra.mxu1 %v1314_v30 }
  0x9e   :  { %1207 = vmatmul.mubr.bf16.vlgmr.msra.gmra.mrb[0].mxu0 %v128_v24  ;;  %1210 = vmatprep.subr.bf16.mxu1 %v1590_v0 }
  0x9f   :  { %475 = vmatpush1.bf16.msra.mxu0 %v1279_v25  ;;  %506 = vmatprep.mubr.bf16.mxu0 %v1592_v1 }
  0xa0   :  { %476 = vmatprep.subr.bf16.mxu0 %v1287_v26  ;;  %466 = vmatmul.mubr.bf16.vlgmr.msra.gmra.mrb[0].mxu1 %v1760_v33 }
  0xa1   :  { %1226 = vmatprep.mubr.msk.bf16.mxu1 %vm1591_vm0, %v1590_v0  ;;  %1211 = vmatpush3.bf16.msra.mxu1 %v1321_v44  ;;  %v1361_v44 = vld [vmem:[#allocation11 + $0x8c] ss:$16 sps:$4 sm:$0xff]  }
  0xa2   :  { %1212 = vmatprep.subr.bf16.mxu1 %v1590_v0 }
  0xa3   :  { %477 = vmatpush1.bf16.msra.mxu0 %v1285_v29 }
  0xa4   :  { %478 = vmatprep.subr.bf16.mxu0 %v1293_v31  ;;  %v1070_v31 = vld [vmem:[%s1821_s3] ss:$0 sm:$0xff] }
  0xa5   :  { %1213 = vmatpush3.bf16.msra.mxu1 %v1322_v45  ;;  %v1359_v45 = vld [vmem:[#allocation11 + $0x88] ss:$16 sps:$4 sm:$0xff]  }
  0xa6   :  { %1214 = vmatprep.subr.bf16.mxu1 %v1590_v0 }
  0xa7   :  { %479 = vmatpush1.bf16.msra.mxu0 %v1291_v32 }
  0xa8   :  { %480 = vmatprep.subr.bf16.mxu0 %v1299_v34 }
  0xa9   :  { %1215 = vmatpush3.bf16.msra.mxu1 %v1323_v46  ;;  %v1367_v46 = vld [vmem:[#allocation11 + $0xac] ss:$16 sps:$4 sm:$0xff]  }
  0xaa   :  { %1216 = vmatprep.subr.bf16.mxu1 %v1590_v0 }
  0xab   :  { %481 = vmatpush1.bf16.msra.mxu0 %v1297_v35 }
  0xac   :  { %482 = vmatprep.subr.bf16.mxu0 %v1305_v36  ;;  %v1335_v36 = vld [vmem:[#allocation11 + $0x8] ss:$16 sps:$4 sm:$0xff]  }
  0xad   :  { %1217 = vmatpush3.bf16.msra.mxu1 %v1324_v47  ;;  %v1365_v47 = vld [vmem:[#allocation11 + $0xa8] ss:$16 sps:$4 sm:$0xff]  }
  0xae   :  { %1218 = vmatprep.subr.bf16.mxu1 %v1590_v0 }
  0xaf   :  { %483 = vmatpush1.bf16.msra.mxu0 %v1303_v37 }
  0xb0   :  { %484 = vmatprep.subr.bf16.mxu0 %v1311_v38  ;;  %v1343_v38 = vld [vmem:[#allocation11 + $0x2c] ss:$16 sps:$4 sm:$0xff]  }
  0xb1   :  { %1219 = vmatpush3.bf16.msra.mxu1 %v1325_v48  ;;  %v1373_v48 = vld [vmem:[#allocation11 + $0xcc] ss:$16 sps:$4 sm:$0xff]  }
  0xb2   :  { %1220 = vmatprep.subr.bf16.mxu1 %v1590_v0 }
  0xb3   :  { %485 = vmatpush1.bf16.msra.mxu0 %v1309_v39  ;;  %v1341_v39 = vld [vmem:[#allocation11 + $0x28] ss:$16 sps:$4 sm:$0xff]  }
  0xb4   :  { %486 = vmatprep.subr.bf16.mxu0 %v1317_v40  ;;  %v1349_v40 = vld [vmem:[#allocation11 + $0x4c] ss:$16 sps:$4 sm:$0xff]  }
  0xb5   :  { %1221 = vmatpush3.bf16.msra.mxu1 %v1326_v49  ;;  %v1376_v49 = vld [vmem:[#allocation11 + $0xec] ss:$16 sps:$4 sm:$0xff]  }
  0xb6   :  { %1222 = vmatprep.subr.bf16.mxu1 %v1590_v0 }
  0xb7   :  { %487 = vmatpush1.bf16.msra.mxu0 %v1315_v41  ;;  %v1347_v41 = vld [vmem:[#allocation11 + $0x48] ss:$16 sps:$4 sm:$0xff]  }
  0xb8   :  { %488 = vmatprep.subr.bf16.mxu0 %v1320_v42  ;;  %v1355_v42 = vld [vmem:[#allocation11 + $0x6c] ss:$16 sps:$4 sm:$0xff]  }
  0xb9   :  { %1223 = vmatpush3.bf16.msra.mxu1 %v1327_v53 }
  0xba   :  { %1224 = vmatprep.subr.bf16.mxu1 %v1590_v0 }
  0xbb   :  { %489 = vmatpush1.bf16.msra.mxu0 %v1318_v43  ;;  %v1353_v43 = vld [vmem:[#allocation11 + $0x68] ss:$16 sps:$4 sm:$0xff]  }
  0xbc   :  { %838 = vmatprep.subr.bf16.mxu0 %v1330_v51 }
  0xbd   :  { %1225 = vmatpush3.bf16.msra.mxu1 %v1331_v55 }
  0xbe   :  { %507 = vmatmul.mubr.bf16.vlgmr.msra.gmra.mrb[4].mxu0 %v1760_v33  ;;  %879 = vmatprep.subr.bf16.mxu1 %v1337_v56 }
  0xbf   :  { %870 = vmatprep.mubr.bf16.mxu0 %v1592_v1  ;;  %839 = vmatpush1.bf16.msra.mxu0 %v1328_v50  ;;  %v1374_v50 = vld [vmem:[#allocation11 + $0xe8] ss:$16 sps:$4 sm:$0xff]  }
  0xc0   :  { %840 = vmatprep.subr.bf16.mxu0 %v1334_v52 }
  0xc3   :  { %841 = vmatpush1.bf16.msra.mxu0 %v1332_v54 }
  0xc4   :  { %842 = vmatprep.subr.bf16.mxu0 %v1340_v57 }
  0xc7   :  { %843 = vmatpush1.bf16.msra.mxu0 %v1338_v58 }
  0xc8   :  { %844 = vmatprep.subr.bf16.mxu0 %v1346_v60  ;;  %v1377_v60 = vld [vmem:[#allocation13] sm:$0xff]  }
  0xcb   :  { %845 = vmatpush1.bf16.msra.mxu0 %v1344_v59 }
  0xcc   :  { %846 = vmatprep.subr.bf16.mxu0 %v1352_v62  ;;  %v1380_v62 = vld [vmem:[#allocation13 + $0x18] sm:$0xff]  }
  0xcf   :  { %847 = vmatpush1.bf16.msra.mxu0 %v1350_v61  ;;  %v1379_v61 = vld [vmem:[#allocation13 + $0x10] sm:$0xff]  }
  0xd0   :  { %848 = vmatprep.subr.bf16.mxu0 %v1358_v2  ;;  %v1382_v2 = vld [vmem:[#allocation13 + $0x28] sm:$0xff]  }
  0xd3   :  { %849 = vmatpush1.bf16.msra.mxu0 %v1356_v63  ;;  %v1381_v63 = vld [vmem:[#allocation13 + $0x20] sm:$0xff]  }
  0xd4   :  { %850 = vmatprep.subr.bf16.mxu0 %v1364_v4  ;;  %v1384_v4 = vld [vmem:[#allocation13 + $0x38] sm:$0xff]  }
  0xd7   :  { %851 = vmatpush1.bf16.msra.mxu0 %v1362_v3  ;;  %v1383_v3 = vld [vmem:[#allocation13 + $0x30] sm:$0xff]  }
  0xd8   :  { %852 = vmatprep.subr.bf16.mxu0 %v1370_v6 }
  0xdb   :  { %853 = vmatpush1.bf16.msra.mxu0 %v1368_v5 }
  0xdc   :  { %1230 = vmatprep.subr.bf16.mxu0 %v1590_v0 }
  0xde   :  { %871 = vmatmul.mubr.bf16.vlgmr.msra.gmra.mrb[8].mxu0 %v1760_v33 }
  0xdf   :  { %1246 = vmatprep.mubr.msk.bf16.mxu0 %vm1591_vm0, %v1590_v0  ;;  %1231 = vmatpush3.bf16.msra.mxu0 %v1377_v60 }
  0xe0   :  { %1232 = vmatprep.subr.bf16.mxu0 %v1590_v0 }
 0x171   :  { %v235_v7 = vpop.f32.mrb[0].mxu0 }
 0x172   :  { %v1208_v8 = vpop.f32.mrb[1].mxu0  ;;  %v236_v32 = vadd.f32 %v1070_v31, %v235_v7 }
 0x173   :  { %v238_v9 = vpop.f32.mrb[2].mxu0  ;;  %v467_v11 = vpop.f32.mrb[0].mxu1 }
 0x174   :  { %v1209_v10 = vpop.f32.mrb[3].mxu0  ;;  %v515_v12 = vand.u32 2147483647, %v467_v11  ;;  %v469_v13 = vpop.f32.mrb[1].mxu1 }
 0x175   :  { %v516_v14 = vand.u32 2147483647, %v469_v13  ;;  %v471_v15 = vpop.f32.mrb[2].mxu1 }
 0x176   :  { %v472_v16 = vpop.f32.mrb[3].mxu1 }
 0x177   :  { %vm517_vm1 = vcmp.gt.f32.partialorder %v516_v14, %v515_v12 }
 0x178   :  { %v518_v17 = vsel %vm517_vm1, %v469_v13, %v467_v11  ;;  %v519_v18 = vsel %vm517_vm1, %v516_v14, %v515_v12 }
 0x191   :  { %v508_v19 = vpop.f32.mrb[4].mxu0 }
 0x192   :  { %v520_v20 = vand.u32 2147483647, %v508_v19  ;;  %v510_v21 = vpop.f32.mrb[5].mxu0 }
 0x193   :  { %v524_v22 = vand.u32 2147483647, %v510_v21  ;;  %v512_v23 = vpop.f32.mrb[6].mxu0 }
 0x194   :  { %vm521_vm2 = vcmp.gt.f32.partialorder %v520_v20, %v519_v18  ;;  %v513_v24 = vpop.f32.mrb[7].mxu0 }
 0x195   :  { %v522_v25 = vsel %vm521_vm2, %v508_v19, %v518_v17  ;;  %v523_v26 = vsel %vm521_vm2, %v520_v20, %v519_v18  ;;  %v1112_v20 = vld [vmem:[%s1824_s6] ss:$0 sm:$0xff] }
 0x196   :  { %vm525_vm3 = vcmp.gt.f32.partialorder %v524_v22, %v523_v26 }
 0x197   :  { %v526_v27 = vsel %vm525_vm3, %v510_v21, %v522_v25  ;;  %v1154_v25 = vld [vmem:[%s1827_s9] ss:$0 sm:$0xff] }
 0x198   :  { %v1111_v28 = vmul.f32 -1.442695, %v526_v27 }
 0x19a   :  { %1385 = vpow2.f32 %v1111_v28 }
 0x1a4   :  { %v1386_v29 = vpop.eup %1385 }
 0x1a5   :  { %v530_v30 = vadd.f32 1.0, %v1386_v29 }
 0x1a7   :  { %1387 = vrcp.f32 %v530_v30 }
 0x1b1   :  { %v1388_v34 = vpop.eup %1387  ;;  %v872_v51 = vpop.f32.mrb[8].mxu0 }
 0x1b2   :  { %v533_v35 = vmul.f32 %v1388_v34, %v236_v32  ;;  %v920_v52 = vand.u32 2147483647, %v872_v51  ;;  %v874_v53 = vpop.f32.mrb[9].mxu0 }
 0x1b3   :  { %v921_v54 = vand.u32 2147483647, %v874_v53  ;;  %v876_v55 = vpop.f32.mrb[10].mxu0 }
 0x1b4   :  { %v534_v37 = vpack.c.bf16 %v533_v35, %v533_v35  ;;  %v877_v56 = vpop.f32.mrb[11].mxu0 }
 0x1b5   :  { %vm1785_vm4 = vcmp.gt.f32.partialorder %v921_v54, %v920_v52 }
 0x1b6   :  { %1227 = vmatmul.mubr.bf16.vlgmr.msra.gmra.mrb[4].mxu1 %v534_v37  ;;  %v923_v58 = vsel %vm1785_vm4, %v874_v53, %v872_v51  ;;  %v924_v59 = vsel %vm1785_vm4, %v921_v54, %v920_v52 }
 0x1b7   :  { %880 = vmatpush1.bf16.msra.mxu1 %v1335_v36  ;;  %911 = vmatprep.mubr.bf16.mxu1 %v1592_v1  ;;  %v1371_v1 = vld [vmem:[#allocation11 + $0xc8] ss:$16 sps:$4 sm:$0xff]  }
 0x1b8   :  { %881 = vmatprep.subr.bf16.mxu1 %v1343_v38 }
 0x1bb   :  { %882 = vmatpush1.bf16.msra.mxu1 %v1341_v39 }
 0x1bc   :  { %883 = vmatprep.subr.bf16.mxu1 %v1349_v40 }
 0x1bf   :  { %884 = vmatpush1.bf16.msra.mxu1 %v1347_v41 }
 0x1c0   :  { %885 = vmatprep.subr.bf16.mxu1 %v1355_v42 }
 0x1c3   :  { %886 = vmatpush1.bf16.msra.mxu1 %v1353_v43 }
 0x1c4   :  { %887 = vmatprep.subr.bf16.mxu1 %v1361_v44 }
 0x1c7   :  { %888 = vmatpush1.bf16.msra.mxu1 %v1359_v45 }
 0x1c8   :  { %889 = vmatprep.subr.bf16.mxu1 %v1367_v46 }
 0x1cb   :  { %890 = vmatpush1.bf16.msra.mxu1 %v1365_v47 }
 0x1cc   :  { %891 = vmatprep.subr.bf16.mxu1 %v1373_v48 }
 0x1cf   :  { %892 = vmatpush1.bf16.msra.mxu1 %v1371_v1 }
 0x1d0   :  { %893 = vmatprep.subr.bf16.mxu1 %v1376_v49 }
 0x1d3   :  { %894 = vmatpush1.bf16.msra.mxu1 %v1374_v50 }
 0x1d6   :  { %912 = vmatmul.mubr.bf16.vlgmr.msra.gmra.mrb[8].mxu1 %v1760_v33  ;;  %v1378_v33 = vld [vmem:[#allocation13 + $0x8] sm:$0xff]  }
 0x1d7   :  { %1233 = vmatpush3.bf16.msra.mxu0 %v1378_v33 }
 0x1d8   :  { %1234 = vmatprep.subr.bf16.mxu0 %v1590_v0 }
 0x1db   :  { %1235 = vmatpush3.bf16.msra.mxu0 %v1379_v61 }
 0x1dc   :  { %1236 = vmatprep.subr.bf16.mxu0 %v1590_v0 }
 0x1df   :  { %1237 = vmatpush3.bf16.msra.mxu0 %v1380_v62 }
 0x1e0   :  { %1238 = vmatprep.subr.bf16.mxu0 %v1590_v0 }
 0x1e3   :  { %1239 = vmatpush3.bf16.msra.mxu0 %v1381_v63 }
 0x1e4   :  { %1240 = vmatprep.subr.bf16.mxu0 %v1590_v0 }
 0x1e7   :  { %1241 = vmatpush3.bf16.msra.mxu0 %v1382_v2 }
 0x1e8   :  { %1242 = vmatprep.subr.bf16.mxu0 %v1590_v0 }
 0x1eb   :  { %1243 = vmatpush3.bf16.msra.mxu0 %v1383_v3 }
 0x1ec   :  { %1244 = vmatprep.subr.bf16.mxu0 %v1590_v0 }
 0x1ef   :  { %1245 = vmatpush3.bf16.msra.mxu0 %v1384_v4 }
 0x289   :  { %v640_v5 = vpop.f32.mrb[4].mxu1 }
 0x28a   :  { %v1228_v6 = vpop.f32.mrb[5].mxu1  ;;  %v641_v21 = vadd.f32 %v1112_v20, %v640_v5 }
 0x28b   :  { %v643_v7 = vpop.f32.mrb[6].mxu1 }
 0x28c   :  { %v1229_v8 = vpop.f32.mrb[7].mxu1 }
 0x2a9   :  { %v913_v9 = vpop.f32.mrb[8].mxu1 }
 0x2aa   :  { %v925_v10 = vand.u32 2147483647, %v913_v9  ;;  %v915_v11 = vpop.f32.mrb[9].mxu1 }
 0x2ab   :  { %v929_v12 = vand.u32 2147483647, %v915_v11  ;;  %v917_v13 = vpop.f32.mrb[10].mxu1 }
 0x2ac   :  { %vm926_vm5 = vcmp.gt.f32.partialorder %v925_v10, %v924_v59  ;;  %v918_v14 = vpop.f32.mrb[11].mxu1 }
 0x2ad   :  { %v927_v15 = vsel %vm926_vm5, %v913_v9, %v923_v58  ;;  %v928_v16 = vsel %vm926_vm5, %v925_v10, %v924_v59 }
 0x2ae   :  { %vm930_vm6 = vcmp.gt.f32.partialorder %v929_v12, %v928_v16 }
 0x2af   :  { %v931_v17 = vsel %vm930_vm6, %v915_v11, %v927_v15 }
 0x2b0   :  { %v1153_v18 = vmul.f32 -1.442695, %v931_v17 }
 0x2b2   :  { %1389 = vpow2.f32 %v1153_v18 }
 0x2bc   :  { %v1390_v19 = vpop.eup %1389 }
 0x2bd   :  { %v935_v0 = vadd.f32 1.0, %v1390_v19 }
 0x2bf   :  { %1391 = vrcp.f32 %v935_v0 }
 0x2c9   :  { %v1392_v22 = vpop.eup %1391 }
 0x2ca   :  { %v938_v23 = vmul.f32 %v1392_v22, %v641_v21 }
 0x2cc   :  { %v939_v24 = vpack.c.bf16 %v938_v23, %v938_v23 }
 0x2ce   :  { %1247 = vmatmul.mubr.bf16.vlgmr.msra.gmra.mrb[12].mxu0 %v939_v24 }
 0x3a1   :  { %v1045_v26 = vpop.f32.mrb[12].mxu0 }
 0x3a2   :  { %v1046_v27 = vadd.f32 %v1154_v25, %v1045_v26  ;;  %v1248_v28 = vpop.f32.mrb[13].mxu0 }
 0x3a3   :  { %v1048_v29 = vpop.f32.mrb[14].mxu0 }
 0x3a4   :  { %1051 = vst [vmem:[#allocation14] sm:$0xff] %v1046_v27  ;;  %v1249_v30 = vpop.f32.mrb[15].mxu0 }
 0x3a5   :  { %1558 = shalt.err (!%p1555_p4)
}
 0x3a6   :  { %s1559_s9 = scalar_lea.hbm %s1828_s10, 128 }
 0x3a7   :  { %p1560_p5 = scmp.ne.s32.totalorder %s1828_s10, %s1559_s9  ;;  %p1563_p6 = scmp.lt.u32.totalorder %s1559_s9, %s1828_s10 }
 0x3a9   :  { %p1565_p7 = pnand %p1563_p6, %p1560_p5 }
 0x3ab   :  { %1568 = shalt.err (!%p1565_p7)
}
 0x3ac   :  { %1061 = dma.vmem_to_hbm [thread:$0]  %s1059_s15, 128, %s1828_s10, [#allocation4]  }
 0x3ad   :  { %1577 = dma.done.wait [#allocation4], 128  }
 0x3ae   :  { %1578 = vsyncadd [#allocation4], 4294967168 }
 0x3af   :  { %1065 = vsyncpa [#allocation3], 1 }
 0x3b0   :  { %1066 = vsyncpa [#allocation6], 1 }
 0x3b1   :  { %1067 = vsyncpa [#allocation9], 1 }
 0x3b2   :  { %1068 = vsyncpa [#allocation12], 1 }
 0x3b3   :  { %1069 = vsyncpa [#allocation4], 1 }

</bundles_post_ra>
